<compile_context>
chip_gen: v6e
topology: v6e:2x2x1
jax: 0.10.0
libtpu: 0.0.40
codegen_flags: <defaults>
</compile_context>

<pallas_src>
import functools

import jax
import jax.numpy as jnp
from jax.experimental import pallas as pl
from jax.experimental.pallas import tpu as pltpu


def _mlp_kernel(x_ref, w1_ref, b1_ref, w2_ref, b2_ref, o_ref):
    """o = relu(relu(x @ w1 + b1) @ w2 + b2) -- BN/bias already folded."""
    # f32 tile from HBM, cast to bf16 in VMEM for the MXU; f32 accumulation.
    x = x_ref[...].astype(jnp.bfloat16)
    h = jnp.dot(x, w1_ref[...], preferred_element_type=jnp.float32)
    h = jnp.maximum(h + b1_ref[...], 0.0)
    y = jnp.dot(h.astype(w2_ref.dtype), w2_ref[...],
                preferred_element_type=jnp.float32)
    o_ref[...] = jnp.maximum(y + b2_ref[...], 0.0).astype(o_ref.dtype)


def _round_up(x, m):
    return ((x + m - 1) // m) * m


def _choose_row_tile(n, *, max_tile=8192, min_split_rows=1024):
    """Row-tile heuristic.

    - Overhead-bound small/medium N: a single grid step (no forced megacore
      split of a sub-microsecond workload).
    - Large N: tiles up to 8192 rows (only a few MB of VMEM on any
      generation) to amortize the ~0.35us/step grid overhead, while keeping
      the 'parallel' axis >= 2 steps so both v7x TensorCores get >= 1024
      rows each.  Tile is a multiple of 8 (f32 sublane granularity); the
      ragged last block is handled by Pallas write-masking.
    """
    if n < 2 * min_split_rows:
        return _round_up(min(n, max_tile), 8)
    return min(max_tile, _round_up(-(-n // 2), 8))


@functools.partial(jax.jit, static_argnames=("row_tile", "out_dtype"))
def conv_layer1_forward(x, params, *, row_tile=None, out_dtype=jnp.float32):
    """x: [N, 2*C_in] f32 post-transfer1 matrix. Returns [N, C_out]."""
    w1, b1, w2, b2 = params          # w: bf16 folded weights, b: f32 folded bias
    n, f_in = x.shape
    hidden = w1.shape[1]
    c_out = w2.shape[1]

    if row_tile is None:
        row_tile = _choose_row_tile(n)

    grid = (pl.cdiv(n, row_tile),)   # ragged last block: OOB reads feed only
                                     # rows whose writes Pallas masks.
    const = lambda i: (0, 0)         # grid-invariant residents (weights/biases)

    out = pl.pallas_call(
        _mlp_kernel,
        out_shape=jax.ShapeDtypeStruct((n, c_out), out_dtype),
        grid_spec=pl.GridSpec(
            grid=grid,
            in_specs=[
                pl.BlockSpec((row_tile, f_in), lambda i: (i, 0)),   # x tile (f32)
                pl.BlockSpec((f_in, hidden), const),                # folded w1 (bf16)
                pl.BlockSpec((1, hidden), const),                   # folded b1 (f32)
                pl.BlockSpec((hidden, c_out), const),               # folded w2 (bf16)
                pl.BlockSpec((1, c_out), const),                    # folded b2 (f32)
            ],
            out_specs=pl.BlockSpec((row_tile, c_out), lambda i: (i, 0)),
        ),
        compiler_params=pltpu.CompilerParams(
            dimension_semantics=("parallel",)),
    )(x, w1, b1, w2, b2)
    return out


def init_raw_params(key, channels_in, channels_out):
    """Deterministic init matching the module's __init__ shapes (weights stored
    pre-transposed as [in, out]); BN in inference mode (running stats)."""
    f_in = 2 * channels_in           # transfer1(..., True) concatenates -> 2*C_in
    hidden = channels_in * 4
    ks = jax.random.split(key, 8)

    lim1 = 1.0 / jnp.sqrt(f_in)
    w1 = jax.random.uniform(ks[0], (f_in, hidden), jnp.float32, -lim1, lim1)
    b1 = jax.random.uniform(ks[1], (1, hidden), jnp.float32, -lim1, lim1)
    lim2 = 1.0 / jnp.sqrt(hidden)
    w2 = jax.random.uniform(ks[2], (hidden, channels_out), jnp.float32, -lim2, lim2)
    b2 = jax.random.uniform(ks[3], (1, channels_out), jnp.float32, -lim2, lim2)

    g1 = jax.random.uniform(ks[4], (1, hidden), jnp.float32, 0.5, 1.5)
    be1 = jax.random.uniform(ks[5], (1, hidden), jnp.float32, -0.5, 0.5)
    m1 = jnp.zeros((1, hidden), jnp.float32)
    v1 = jnp.ones((1, hidden), jnp.float32)

    g2 = jax.random.uniform(ks[6], (1, channels_out), jnp.float32, 0.5, 1.5)
    be2 = jax.random.uniform(ks[7], (1, channels_out), jnp.float32, -0.5, 0.5)
    m2 = jnp.zeros((1, channels_out), jnp.float32)
    v2 = jnp.ones((1, channels_out), jnp.float32)

    return (w1, b1, w2, b2, g1, be1, m1, v1, g2, be2, m2, v2)


def fold_params(raw, eps=1e-5, training=False):
    """Fold inference-mode BatchNorm + bias into the linear weights and cast
    the matmul operands to bf16 (biases stay f32 for the f32 epilogue).

    Guard: folding is ONLY valid with running statistics (inference mode);
    training-mode batch statistics must never reach this function.
    """
    if training:
        raise ValueError("fold_params is only valid for inference-mode "
                         "BatchNorm (running statistics).")
    (w1, b1, w2, b2, g1, be1, m1, v1, g2, be2, m2, v2) = raw
    s1 = g1 / jnp.sqrt(v1 + eps)
    t1 = be1 - m1 * s1
    s2 = g2 / jnp.sqrt(v2 + eps)
    t2 = be2 - m2 * s2

    w1f = (w1 * s1).astype(jnp.bfloat16)
    b1f = (b1 * s1 + t1).astype(jnp.float32)
    w2f = (w2 * s2).astype(jnp.bfloat16)
    b2f = (b2 * s2 + t2).astype(jnp.float32)
    return (w1f, b1f, w2f, b2f)


def reference_forward(x, params, out_dtype=jnp.float32):
    """Pure-JAX reference with the same numerics as the kernel
    (bf16 matmul operands, f32 accumulation + epilogue)."""
    w1, b1, w2, b2 = params
    xb = x.astype(jnp.bfloat16)
    h = jnp.maximum(jnp.dot(xb, w1, preferred_element_type=jnp.float32) + b1, 0.0)
    hb = h.astype(jnp.bfloat16)
    y = jnp.maximum(jnp.dot(hb, w2, preferred_element_type=jnp.float32) + b2, 0.0)
    return y.astype(out_dtype)


if __name__ == "__main__":
    channels_in, channels_out, hop_count = 16, 32, 2   # hop_count only affects the ptens side
    n_atoms = 130   # total atoms after transfer1; deliberately NOT a tile multiple

    key = jax.random.PRNGKey(0)
    kx, kp = jax.random.split(key)
    # Matrix that x.transfer1(G.nhoods(hop_count), G, True).torch() would produce.
    x = jax.random.normal(kx, (n_atoms, 2 * channels_in), jnp.float32)
    params = fold_params(init_raw_params(kp, channels_in, channels_out))

    ref = reference_forward(x, params)

    # Default path: single ragged grid step (tile = round_up(130, 8) = 136).
    out = jax.block_until_ready(conv_layer1_forward(x, params))
    assert out.shape == (n_atoms, channels_out)
    assert out.dtype == jnp.float32
    assert jnp.allclose(out, ref, atol=1e-3, rtol=1e-3), \
        float(jnp.max(jnp.abs(out - ref)))

    # Multi-step path with a masked ragged last block (grid = cdiv(130, 64) = 3).
    out2 = jax.block_until_ready(conv_layer1_forward(x, params, row_tile=64))
    assert jnp.allclose(out2, ref, atol=1e-3, rtol=1e-3), \
        float(jnp.max(jnp.abs(out2 - ref)))

    print("KERNEL_OK")
</pallas_src>

<mosaic_0001>
module attributes {stable_mosaic.version = 11 : i64} {
  func.func @_mlp_kernel(%arg0: i32, %arg1: memref<136x32xf32, #tpu.memory_space<vmem>>, %arg2: memref<32x64xbf16, #tpu.memory_space<vmem>>, %arg3: memref<1x64xf32, #tpu.memory_space<vmem>>, %arg4: memref<64x32xbf16, #tpu.memory_space<vmem>>, %arg5: memref<1x32xf32, #tpu.memory_space<vmem>>, %arg6: memref<136x32xf32, #tpu.memory_space<vmem>>) attributes {dimension_semantics = [#tpu.dimension_semantics<parallel>], iteration_bounds = array<i64: 1>, scalar_prefetch = 0 : i64, scratch_operands = 0 : i64, tpu.core_type = #tpu.core_type<tc>, window_params = [{transform_indices = @transform_0, window_bounds = array<i64: 136, 32>}, {pipeline_mode = #tpu.pipeline_mode<synchronous>, transform_indices = @transform_1, window_bounds = array<i64: 32, 64>}, {pipeline_mode = #tpu.pipeline_mode<synchronous>, transform_indices = @transform_2, window_bounds = array<i64: 1, 64>}, {pipeline_mode = #tpu.pipeline_mode<synchronous>, transform_indices = @transform_3, window_bounds = array<i64: 64, 32>}, {pipeline_mode = #tpu.pipeline_mode<synchronous>, transform_indices = @transform_4, window_bounds = array<i64: 1, 32>}, {transform_indices = @transform_5, window_bounds = array<i64: 136, 32>}]} {
    %c0 = arith.constant 0 : index
    %c0_0 = arith.constant 0 : index
    %0 = vector.load %arg1[%c0, %c0_0] : memref<136x32xf32, #tpu.memory_space<vmem>>, vector<136x32xf32>
    %1 = arith.truncf %0 : vector<136x32xf32> to vector<136x32xbf16>
    %c0_1 = arith.constant 0 : index
    %c0_2 = arith.constant 0 : index
    %2 = vector.load %arg2[%c0_1, %c0_2] : memref<32x64xbf16, #tpu.memory_space<vmem>>, vector<32x64xbf16>
    %cst = arith.constant dense<0.000000e+00> : vector<136x64xf32>
    %3 = tpu.matmul %1, %2, %cst {dimension_numbers = #tpu.dot_dimension_numbers<[1], [0], [0], [1], [0, 0, 1, 1], [], []>} : vector<136x32xbf16>, vector<32x64xbf16>, vector<136x64xf32> -> vector<136x64xf32>
    %c0_3 = arith.constant 0 : index
    %c0_4 = arith.constant 0 : index
    %4 = vector.load %arg3[%c0_3, %c0_4] : memref<1x64xf32, #tpu.memory_space<vmem>>, vector<1x64xf32>
    %5 = vector.broadcast %4 : vector<1x64xf32> to vector<136x64xf32>
    %6 = arith.addf %3, %5 : vector<136x64xf32>
    %cst_5 = arith.constant 0.000000e+00 : f32
    %7 = vector.broadcast %cst_5 : f32 to vector<136x64xf32>
    %8 = arith.maximumf %6, %7 : vector<136x64xf32>
    %9 = arith.truncf %8 : vector<136x64xf32> to vector<136x64xbf16>
    %c0_6 = arith.constant 0 : index
    %c0_7 = arith.constant 0 : index
    %10 = vector.load %arg4[%c0_6, %c0_7] : memref<64x32xbf16, #tpu.memory_space<vmem>>, vector<64x32xbf16>
    %cst_8 = arith.constant dense<0.000000e+00> : vector<136x32xf32>
    %11 = tpu.matmul %9, %10, %cst_8 {dimension_numbers = #tpu.dot_dimension_numbers<[1], [0], [0], [1], [0, 0, 1, 1], [], []>} : vector<136x64xbf16>, vector<64x32xbf16>, vector<136x32xf32> -> vector<136x32xf32>
    %c0_9 = arith.constant 0 : index
    %c0_10 = arith.constant 0 : index
    %12 = vector.load %arg5[%c0_9, %c0_10] : memref<1x32xf32, #tpu.memory_space<vmem>>, vector<1x32xf32>
    %13 = vector.broadcast %12 : vector<1x32xf32> to vector<136x32xf32>
    %14 = arith.addf %11, %13 : vector<136x32xf32>
    %cst_11 = arith.constant 0.000000e+00 : f32
    %15 = vector.broadcast %cst_11 : f32 to vector<136x32xf32>
    %16 = arith.maximumf %14, %15 : vector<136x32xf32>
    %c0_12 = arith.constant 0 : index
    %c0_13 = arith.constant 0 : index
    %17 = vector.load %arg6[%c0_12, %c0_13] : memref<136x32xf32, #tpu.memory_space<vmem>>, vector<136x32xf32>
    tpu.vector_store %arg6[%c0_12, %c0_13], %16 {strides = array<i32>} : memref<136x32xf32, #tpu.memory_space<vmem>>, vector<136x32xf32>,
    return
  }
  func.func @transform_0(%arg0: i32) -> (i32, i32) {
    %c0_i32 = arith.constant 0 : i32
    %c0_i32_0 = arith.constant 0 : i32
    return %arg0, %c0_i32 : i32, i32
  }
  func.func @transform_1(%arg0: i32) -> (i32, i32) {
    %c0_i32 = arith.constant 0 : i32
    %c0_i32_0 = arith.constant 0 : i32
    %c0_i32_1 = arith.constant 0 : i32
    return %c0_i32, %c0_i32_0 : i32, i32
  }
  func.func @transform_2(%arg0: i32) -> (i32, i32) {
    %c0_i32 = arith.constant 0 : i32
    %c0_i32_0 = arith.constant 0 : i32
    %c0_i32_1 = arith.constant 0 : i32
    return %c0_i32, %c0_i32_0 : i32, i32
  }
  func.func @transform_3(%arg0: i32) -> (i32, i32) {
    %c0_i32 = arith.constant 0 : i32
    %c0_i32_0 = arith.constant 0 : i32
    %c0_i32_1 = arith.constant 0 : i32
    return %c0_i32, %c0_i32_0 : i32, i32
  }
  func.func @transform_4(%arg0: i32) -> (i32, i32) {
    %c0_i32 = arith.constant 0 : i32
    %c0_i32_0 = arith.constant 0 : i32
    %c0_i32_1 = arith.constant 0 : i32
    return %c0_i32, %c0_i32_0 : i32, i32
  }
  func.func @transform_5(%arg0: i32) -> (i32, i32) {
    %c0_i32 = arith.constant 0 : i32
    %c0_i32_0 = arith.constant 0 : i32
    return %arg0, %c0_i32 : i32, i32
  }
}

</mosaic_0001>

<bundles_post_ra>
// kernel: conv_layer1_forward.1
= control target key start
LH: loop header
LB: loop body
LE: loop exit
PB: predicated region body
PF: predicated region fallthrough
CT: control target
= control target key end

     0   :  { %v579_v0 = vmov 0.0   ;;  %vm580_vm0 = vmmov 0   ;;  %vm70_vm1 = vcmask 261120   ;;  %vm267_vm2 = vcmask 523264   ;;  %s852_s1 = inlined_call_operand.vmem [shape: bf16[32,64], index: 1, kind: input, shape index: {}]   ;;  %s853_s0 = inlined_call_operand.vmem [shape: f32[130,32], index: 0, kind: input, shape index: {}]   ;;  %s854_s3 = inlined_call_operand.vmem [shape: bf16[64,32], index: 3, kind: input, shape index: {}]   ;;  %s855_s2 = inlined_call_operand.vmem [shape: f32[1,64], index: 2, kind: input, shape index: {}]   ;;  %s856_s4 = inlined_call_operand.vmem [shape: f32[1,32], index: 4, kind: input, shape index: {}]   ;;  %s857_s5 = inlined_call_operand.vmem [shape: f32[130,32], index: 5, kind: output, shape index: {}]  }
   0x1   :  { %487 = vmatprep.subr.bf16.mxu0 %v579_v0  ;;  %v573_v1 = vld [vmem:[%s852_s1 + $0x8] sm:$0xff]   ;;  %491 = vmatprep.mubr.msk.bf16.mxu0 %vm580_vm0, %v579_v0  ;;  %v574_v2 = vld [vmem:[%s852_s1] sm:$0xff]   ;;  %v23_v6 = vld [vmem:[%s853_s0 + $0x10] sm:$0xff] }
   0x2   :  { %527 = vmatprep.subr.bf16.mxu1 %v579_v0  ;;  %535 = vmatprep.mubr.msk.bf16.mxu1 %vm580_vm0, %v579_v0  ;;  %v21_v3 = vld [vmem:[%s853_s0] sm:$0xff]  ;;  %v22_v4 = vld [vmem:[%s853_s0 + $0x8] sm:$0xff]  ;;  %v24_v7 = vld [vmem:[%s853_s0 + $0x18] sm:$0xff] }
   0x3   :  { %488 = vmatpush3.bf16.msra.mxu0 %v573_v1  ;;  %v38_v5 = vpack.c.bf16 %v22_v4, %v21_v3  ;;  %v575_v8 = vld [vmem:[%s854_s3 + $0x18] sm:$0xff]   ;;  %v39_v9 = vpack.c.bf16 %v24_v7, %v23_v6  ;;  %v25_v10 = vld [vmem:[%s853_s0 + $0x20] sm:$0xff]  ;;  %v26_v11 = vld [vmem:[%s853_s0 + $0x28] sm:$0xff] }
   0x4   :  { %489 = vmatprep.subr.bf16.mxu0 %v579_v0  ;;  %528 = vmatpush3.bf16.msra.mxu1 %v575_v8  ;;  %v40_v12 = vpack.c.bf16 %v26_v11, %v25_v10  ;;  %v27_v13 = vld [vmem:[%s853_s0 + $0x30] sm:$0xff]  ;;  %v28_v14 = vld [vmem:[%s853_s0 + $0x38] sm:$0xff]  ;;  %v29_v16 = vld [vmem:[%s853_s0 + $0x40] sm:$0xff] }
   0x5   :  { %529 = vmatprep.subr.bf16.mxu1 %v579_v0  ;;  %v41_v15 = vpack.c.bf16 %v28_v14, %v27_v13  ;;  %v30_v17 = vld [vmem:[%s853_s0 + $0x48] sm:$0xff]  ;;  %v31_v19 = vld [vmem:[%s853_s0 + $0x50] sm:$0xff]  ;;  %v32_v20 = vld [vmem:[%s853_s0 + $0x58] sm:$0xff] }
   0x6   :  { %v42_v18 = vpack.c.bf16 %v30_v17, %v29_v16  ;;  %v43_v21 = vpack.c.bf16 %v32_v20, %v31_v19  ;;  %v33_v22 = vld [vmem:[%s853_s0 + $0x60] sm:$0xff]  ;;  %v34_v23 = vld [vmem:[%s853_s0 + $0x68] sm:$0xff]  ;;  %v35_v25 = vld [vmem:[%s853_s0 + $0x70] sm:$0xff] }
   0x7   :  { %490 = vmatpush3.bf16.msra.mxu0 %v574_v2  ;;  %v44_v24 = vpack.c.bf16 %v34_v23, %v33_v22  ;;  %v36_v26 = vld [vmem:[%s853_s0 + $0x78] sm:$0xff]  ;;  %v37_v28 = vld [vmem:[%s853_s0 + $0x80] sm:$0xff]  ;;  %v576_v30 = vld [vmem:[%s854_s3 + $0x10] sm:$0xff]  }
   0x8   :  { %v45_v27 = vpack.c.bf16 %v36_v26, %v35_v25  ;;  %v46_v29 = vpack.c.bf16 %v37_v28, %v37_v28  ;;  %530 = vmatpush3.bf16.msra.mxu1 %v576_v30  ;;  %v577_v31 = vld [vmem:[%s854_s3 + $0x8] sm:$0xff]   ;;  %v578_v32 = vld [vmem:[%s854_s3] sm:$0xff]  }
   0x9   :  { %531 = vmatprep.subr.bf16.mxu1 %v579_v0  ;;  %v718_v33 = vld [vmem:[%s855_s2] ss:$0 sm:$0xff] }
   0xa   :  { %492 = vmatmul.mubr.msk.bf16.vlgmr.msra.gmra.mxu0 %vm70_vm1, %v38_v5 }
   0xb   :  { %495 = vmatprep.mubr.msk.bf16.mxu0 %vm580_vm0, %v579_v0 }
   0xc   :  { %532 = vmatpush3.bf16.msra.mxu1 %v577_v31 }
   0xd   :  { %533 = vmatprep.subr.bf16.mxu1 %v579_v0 }
  0x10   :  { %534 = vmatpush3.bf16.msra.mxu1 %v578_v32 }
  0x12   :  { %496 = vmatmul.mubr.msk.bf16.gmra.mxu0 %vm70_vm1, %v39_v9 }
  0x13   :  { %499 = vmatprep.mubr.msk.bf16.mxu0 %vm580_vm0, %v579_v0 }
  0x1a   :  { %500 = vmatmul.mubr.msk.bf16.gmra.mxu0 %vm70_vm1, %v40_v12 }
  0x1b   :  { %503 = vmatprep.mubr.msk.bf16.mxu0 %vm580_vm0, %v579_v0 }
  0x22   :  { %504 = vmatmul.mubr.msk.bf16.gmra.mxu0 %vm70_vm1, %v41_v15 }
  0x23   :  { %507 = vmatprep.mubr.msk.bf16.mxu0 %vm580_vm0, %v579_v0 }
  0x2a   :  { %508 = vmatmul.mubr.msk.bf16.gmra.mxu0 %vm70_vm1, %v42_v18 }
  0x2b   :  { %511 = vmatprep.mubr.msk.bf16.mxu0 %vm580_vm0, %v579_v0 }
  0x32   :  { %512 = vmatmul.mubr.msk.bf16.gmra.mxu0 %vm70_vm1, %v43_v21 }
  0x33   :  { %515 = vmatprep.mubr.msk.bf16.mxu0 %vm580_vm0, %v579_v0 }
  0x3a   :  { %516 = vmatmul.mubr.msk.bf16.gmra.mxu0 %vm70_vm1, %v44_v24 }
  0x3b   :  { %519 = vmatprep.mubr.msk.bf16.mxu0 %vm580_vm0, %v579_v0 }
  0x42   :  { %520 = vmatmul.mubr.msk.bf16.gmra.mxu0 %vm70_vm1, %v45_v27 }
  0x43   :  { %523 = vmatprep.mubr.msk.bf16.mxu0 %vm580_vm0, %v579_v0 }
  0x4a   :  { %524 = vmatmul.mubr.msk.bf16.gmra.mxu0 %vm70_vm1, %v46_v29 }
  0xca   :  { %v132_v34 = vpop.f32.mrf.mxu0 }
  0xcb   :  { %v133_v36 = vadd.f32 %v718_v33, %v132_v34 }
  0xcc   :  { %v493_v35 = vpop.f32.mrf.mxu0 }
  0xcd   :  { %v202_v40 = vmax.f32 %v133_v36, 0.0 }
  0xce   :  { %v135_v37 = vpop.f32.mrf.mxu0 }
  0xcf   :  { %v136_v38 = vadd.f32 %v718_v33, %v135_v37 }
  0xd0   :  { %v494_v39 = vpop.f32.mrf.mxu0 }
  0xd1   :  { %v203_v41 = vmax.f32 %v136_v38, 0.0 }
  0xd2   :  { %v140_v42 = vpop.f32.mrf.mxu0 }
  0xd3   :  { %v219_v43 = vpack.c.bf16 %v203_v41, %v202_v40  ;;  %v141_v45 = vadd.f32 %v718_v33, %v140_v42 }
  0xd4   :  { %v497_v44 = vpop.f32.mrf.mxu0 }
  0xd5   :  { %536 = vmatmul.mubr.msk.bf16.vlgmr.msra.gmra.mxu1 %vm267_vm2, %v219_v43  ;;  %v204_v49 = vmax.f32 %v141_v45, 0.0 }
  0xd6   :  { %v143_v46 = vpop.f32.mrf.mxu0  ;;  %539 = vmatprep.mubr.msk.bf16.mxu1 %vm580_vm0, %v579_v0 }
  0xd7   :  { %v144_v47 = vadd.f32 %v718_v33, %v143_v46 }
  0xd8   :  { %v498_v48 = vpop.f32.mrf.mxu0 }
  0xd9   :  { %v205_v50 = vmax.f32 %v144_v47, 0.0 }
  0xda   :  { %v148_v51 = vpop.f32.mrf.mxu0 }
  0xdb   :  { %v220_v52 = vpack.c.bf16 %v205_v50, %v204_v49  ;;  %v149_v54 = vadd.f32 %v718_v33, %v148_v51  ;;  %v765_v51 = vld [vmem:[%s856_s4] ss:$0 sm:$0xff] }
  0xdc   :  { %v501_v53 = vpop.f32.mrf.mxu0 }
  0xdd   :  { %540 = vmatmul.mubr.msk.bf16.gmra.mxu1 %vm267_vm2, %v220_v52  ;;  %v206_v58 = vmax.f32 %v149_v54, 0.0 }
  0xde   :  { %v151_v55 = vpop.f32.mrf.mxu0  ;;  %543 = vmatprep.mubr.msk.bf16.mxu1 %vm580_vm0, %v579_v0 }
  0xdf   :  { %v152_v56 = vadd.f32 %v718_v33, %v151_v55 }
  0xe0   :  { %v502_v57 = vpop.f32.mrf.mxu0 }
  0xe1   :  { %v207_v59 = vmax.f32 %v152_v56, 0.0 }
  0xe2   :  { %v156_v60 = vpop.f32.mrf.mxu0 }
  0xe3   :  { %v221_v61 = vpack.c.bf16 %v207_v59, %v206_v58  ;;  %v157_v63 = vadd.f32 %v718_v33, %v156_v60 }
  0xe4   :  { %v505_v62 = vpop.f32.mrf.mxu0 }
  0xe5   :  { %544 = vmatmul.mubr.msk.bf16.gmra.mxu1 %vm267_vm2, %v221_v61  ;;  %v208_v4 = vmax.f32 %v157_v63, 0.0 }
  0xe6   :  { %v159_v1 = vpop.f32.mrf.mxu0  ;;  %547 = vmatprep.mubr.msk.bf16.mxu1 %vm580_vm0, %v579_v0 }
  0xe7   :  { %v160_v2 = vadd.f32 %v718_v33, %v159_v1 }
  0xe8   :  { %v506_v3 = vpop.f32.mrf.mxu0 }
  0xe9   :  { %v209_v5 = vmax.f32 %v160_v2, 0.0 }
  0xea   :  { %v164_v6 = vpop.f32.mrf.mxu0 }
  0xeb   :  { %v222_v7 = vpack.c.bf16 %v209_v5, %v208_v4  ;;  %v165_v9 = vadd.f32 %v718_v33, %v164_v6 }
  0xec   :  { %v509_v8 = vpop.f32.mrf.mxu0 }
  0xed   :  { %548 = vmatmul.mubr.msk.bf16.gmra.mxu1 %vm267_vm2, %v222_v7  ;;  %v210_v13 = vmax.f32 %v165_v9, 0.0 }
  0xee   :  { %v167_v10 = vpop.f32.mrf.mxu0  ;;  %551 = vmatprep.mubr.msk.bf16.mxu1 %vm580_vm0, %v579_v0 }
  0xef   :  { %v168_v11 = vadd.f32 %v718_v33, %v167_v10 }
  0xf0   :  { %v510_v12 = vpop.f32.mrf.mxu0 }
  0xf1   :  { %v211_v14 = vmax.f32 %v168_v11, 0.0 }
  0xf2   :  { %v172_v15 = vpop.f32.mrf.mxu0 }
  0xf3   :  { %v223_v16 = vpack.c.bf16 %v211_v14, %v210_v13  ;;  %v173_v18 = vadd.f32 %v718_v33, %v172_v15 }
  0xf4   :  { %v513_v17 = vpop.f32.mrf.mxu0 }
  0xf5   :  { %552 = vmatmul.mubr.msk.bf16.gmra.mxu1 %vm267_vm2, %v223_v16  ;;  %v212_v22 = vmax.f32 %v173_v18, 0.0 }
  0xf6   :  { %v175_v19 = vpop.f32.mrf.mxu0  ;;  %555 = vmatprep.mubr.msk.bf16.mxu1 %vm580_vm0, %v579_v0 }
  0xf7   :  { %v176_v20 = vadd.f32 %v718_v33, %v175_v19 }
  0xf8   :  { %v514_v21 = vpop.f32.mrf.mxu0 }
  0xf9   :  { %v213_v23 = vmax.f32 %v176_v20, 0.0 }
  0xfa   :  { %v180_v24 = vpop.f32.mrf.mxu0 }
  0xfb   :  { %v224_v25 = vpack.c.bf16 %v213_v23, %v212_v22  ;;  %v181_v27 = vadd.f32 %v718_v33, %v180_v24 }
  0xfc   :  { %v517_v26 = vpop.f32.mrf.mxu0 }
  0xfd   :  { %556 = vmatmul.mubr.msk.bf16.gmra.mxu1 %vm267_vm2, %v224_v25  ;;  %v214_v31 = vmax.f32 %v181_v27, 0.0 }
  0xfe   :  { %v183_v28 = vpop.f32.mrf.mxu0  ;;  %559 = vmatprep.mubr.msk.bf16.mxu1 %vm580_vm0, %v579_v0 }
  0xff   :  { %v184_v29 = vadd.f32 %v718_v33, %v183_v28 }
 0x100   :  { %v518_v30 = vpop.f32.mrf.mxu0 }
 0x101   :  { %v215_v32 = vmax.f32 %v184_v29, 0.0 }
 0x102   :  { %v188_v34 = vpop.f32.mrf.mxu0 }
 0x103   :  { %v225_v35 = vpack.c.bf16 %v215_v32, %v214_v31  ;;  %v189_v37 = vadd.f32 %v718_v33, %v188_v34 }
 0x104   :  { %v521_v36 = vpop.f32.mrf.mxu0 }
 0x105   :  { %560 = vmatmul.mubr.msk.bf16.gmra.mxu1 %vm267_vm2, %v225_v35  ;;  %v216_v41 = vmax.f32 %v189_v37, 0.0 }
 0x106   :  { %v191_v38 = vpop.f32.mrf.mxu0  ;;  %563 = vmatprep.mubr.msk.bf16.mxu1 %vm580_vm0, %v579_v0 }
 0x107   :  { %v192_v39 = vadd.f32 %v718_v33, %v191_v38 }
 0x108   :  { %v522_v40 = vpop.f32.mrf.mxu0 }
 0x109   :  { %v217_v42 = vmax.f32 %v192_v39, 0.0 }
 0x10a   :  { %v196_v43 = vpop.f32.mrf.mxu0 }
 0x10b   :  { %v226_v44 = vpack.c.bf16 %v217_v42, %v216_v41  ;;  %v197_v45 = vadd.f32 %v718_v33, %v196_v43 }
 0x10c   :  { %v525_v46 = vpop.f32.mrf.mxu0 }
 0x10d   :  { %v218_v47 = vmax.f32 %v197_v45, 0.0  ;;  %564 = vmatmul.mubr.msk.bf16.gmra.mxu1 %vm267_vm2, %v226_v44 }
 0x10e   :  { %v199_v48 = vpop.f32.mrf.mxu0  ;;  %567 = vmatprep.mubr.msk.bf16.mxu1 %vm580_vm0, %v579_v0 }
 0x10f   :  { %v227_v50 = vpack.c.bf16 %v218_v47, %v218_v47 }
 0x110   :  { %v526_v49 = vpop.f32.mrf.mxu0 }
 0x115   :  { %568 = vmatmul.mubr.msk.bf16.gmra.mxu1 %vm267_vm2, %v227_v50 }
 0x195   :  { %v329_v52 = vpop.f32.mrf.mxu1 }
 0x196   :  { %v330_v33 = vadd.f32 %v765_v51, %v329_v52 }
 0x197   :  { %v537_v53 = vpop.f32.mrf.mxu1 }
 0x198   :  { %v399_v54 = vmax.f32 %v330_v33, 0.0 }
 0x199   :  { %v332_v55 = vpop.f32.mrf.mxu1 }
 0x19a   :  { %416 = vst.msk [vmem:[%s857_s5] sm:$0xff] %vm70_vm1, %v399_v54  ;;  %v333_v0 = vadd.f32 %v765_v51, %v332_v55 }
 0x19b   :  { %v538_v56 = vpop.f32.mrf.mxu1 }
 0x19c   :  { %v400_v57 = vmax.f32 %v333_v0, 0.0 }
 0x19d   :  { %v337_v58 = vpop.f32.mrf.mxu1 }
 0x19e   :  { %417 = vst.msk [vmem:[%s857_s5 + $0x8] sm:$0xff] %vm70_vm1, %v400_v57  ;;  %v338_v59 = vadd.f32 %v765_v51, %v337_v58 }
 0x19f   :  { %v541_v60 = vpop.f32.mrf.mxu1 }
 0x1a0   :  { %v401_v61 = vmax.f32 %v338_v59, 0.0 }
 0x1a1   :  { %v340_v62 = vpop.f32.mrf.mxu1 }
 0x1a2   :  { %418 = vst.msk [vmem:[%s857_s5 + $0x10] sm:$0xff] %vm70_vm1, %v401_v61  ;;  %v341_v63 = vadd.f32 %v765_v51, %v340_v62 }
 0x1a3   :  { %v542_v1 = vpop.f32.mrf.mxu1 }
 0x1a4   :  { %v402_v2 = vmax.f32 %v341_v63, 0.0 }
 0x1a5   :  { %v345_v3 = vpop.f32.mrf.mxu1 }
 0x1a6   :  { %419 = vst.msk [vmem:[%s857_s5 + $0x18] sm:$0xff] %vm70_vm1, %v402_v2  ;;  %v346_v4 = vadd.f32 %v765_v51, %v345_v3 }
 0x1a7   :  { %v545_v5 = vpop.f32.mrf.mxu1 }
 0x1a8   :  { %v403_v6 = vmax.f32 %v346_v4, 0.0 }
 0x1a9   :  { %v348_v7 = vpop.f32.mrf.mxu1 }
 0x1aa   :  { %420 = vst.msk [vmem:[%s857_s5 + $0x20] sm:$0xff] %vm70_vm1, %v403_v6  ;;  %v349_v8 = vadd.f32 %v765_v51, %v348_v7 }
 0x1ab   :  { %v546_v9 = vpop.f32.mrf.mxu1 }
 0x1ac   :  { %v404_v10 = vmax.f32 %v349_v8, 0.0 }
 0x1ad   :  { %v353_v11 = vpop.f32.mrf.mxu1 }
 0x1ae   :  { %421 = vst.msk [vmem:[%s857_s5 + $0x28] sm:$0xff] %vm70_vm1, %v404_v10  ;;  %v354_v12 = vadd.f32 %v765_v51, %v353_v11 }
 0x1af   :  { %v549_v13 = vpop.f32.mrf.mxu1 }
 0x1b0   :  { %v405_v14 = vmax.f32 %v354_v12, 0.0 }
 0x1b1   :  { %v356_v15 = vpop.f32.mrf.mxu1 }
 0x1b2   :  { %422 = vst.msk [vmem:[%s857_s5 + $0x30] sm:$0xff] %vm70_vm1, %v405_v14  ;;  %v357_v16 = vadd.f32 %v765_v51, %v356_v15 }
 0x1b3   :  { %v550_v17 = vpop.f32.mrf.mxu1 }
 0x1b4   :  { %v406_v18 = vmax.f32 %v357_v16, 0.0 }
 0x1b5   :  { %v361_v19 = vpop.f32.mrf.mxu1 }
 0x1b6   :  { %423 = vst.msk [vmem:[%s857_s5 + $0x38] sm:$0xff] %vm70_vm1, %v406_v18  ;;  %v362_v20 = vadd.f32 %v765_v51, %v361_v19 }
 0x1b7   :  { %v553_v21 = vpop.f32.mrf.mxu1 }
 0x1b8   :  { %v407_v22 = vmax.f32 %v362_v20, 0.0 }
 0x1b9   :  { %v364_v23 = vpop.f32.mrf.mxu1 }
 0x1ba   :  { %424 = vst.msk [vmem:[%s857_s5 + $0x40] sm:$0xff] %vm70_vm1, %v407_v22  ;;  %v365_v24 = vadd.f32 %v765_v51, %v364_v23 }
 0x1bb   :  { %v554_v25 = vpop.f32.mrf.mxu1 }
 0x1bc   :  { %v408_v26 = vmax.f32 %v365_v24, 0.0 }
 0x1bd   :  { %v369_v27 = vpop.f32.mrf.mxu1 }
 0x1be   :  { %425 = vst.msk [vmem:[%s857_s5 + $0x48] sm:$0xff] %vm70_vm1, %v408_v26  ;;  %v370_v28 = vadd.f32 %v765_v51, %v369_v27 }
 0x1bf   :  { %v557_v29 = vpop.f32.mrf.mxu1 }
 0x1c0   :  { %v409_v30 = vmax.f32 %v370_v28, 0.0 }
 0x1c1   :  { %v372_v31 = vpop.f32.mrf.mxu1 }
 0x1c2   :  { %426 = vst.msk [vmem:[%s857_s5 + $0x50] sm:$0xff] %vm70_vm1, %v409_v30  ;;  %v373_v32 = vadd.f32 %v765_v51, %v372_v31 }
 0x1c3   :  { %v558_v34 = vpop.f32.mrf.mxu1 }
 0x1c4   :  { %v410_v35 = vmax.f32 %v373_v32, 0.0 }
 0x1c5   :  { %v377_v36 = vpop.f32.mrf.mxu1 }
 0x1c6   :  { %427 = vst.msk [vmem:[%s857_s5 + $0x58] sm:$0xff] %vm70_vm1, %v410_v35  ;;  %v378_v37 = vadd.f32 %v765_v51, %v377_v36 }
 0x1c7   :  { %v561_v38 = vpop.f32.mrf.mxu1 }
 0x1c8   :  { %v411_v39 = vmax.f32 %v378_v37, 0.0 }
 0x1c9   :  { %v380_v40 = vpop.f32.mrf.mxu1 }
 0x1ca   :  { %428 = vst.msk [vmem:[%s857_s5 + $0x60] sm:$0xff] %vm70_vm1, %v411_v39  ;;  %v381_v41 = vadd.f32 %v765_v51, %v380_v40 }
 0x1cb   :  { %v562_v42 = vpop.f32.mrf.mxu1 }
 0x1cc   :  { %v412_v43 = vmax.f32 %v381_v41, 0.0 }
 0x1cd   :  { %v385_v44 = vpop.f32.mrf.mxu1 }
 0x1ce   :  { %429 = vst.msk [vmem:[%s857_s5 + $0x68] sm:$0xff] %vm70_vm1, %v412_v43  ;;  %v386_v45 = vadd.f32 %v765_v51, %v385_v44 }
 0x1cf   :  { %v565_v46 = vpop.f32.mrf.mxu1 }
 0x1d0   :  { %v413_v47 = vmax.f32 %v386_v45, 0.0 }
 0x1d1   :  { %v388_v48 = vpop.f32.mrf.mxu1 }
 0x1d2   :  { %430 = vst.msk [vmem:[%s857_s5 + $0x70] sm:$0xff] %vm70_vm1, %v413_v47  ;;  %v389_v49 = vadd.f32 %v765_v51, %v388_v48 }
 0x1d3   :  { %v566_v50 = vpop.f32.mrf.mxu1 }
 0x1d4   :  { %v414_v52 = vmax.f32 %v389_v49, 0.0 }
 0x1d5   :  { %v393_v33 = vpop.f32.mrf.mxu1 }
 0x1d6   :  { %431 = vst.msk [vmem:[%s857_s5 + $0x78] sm:$0xff] %vm70_vm1, %v414_v52  ;;  %v394_v53 = vadd.f32 %v765_v51, %v393_v33 }
 0x1d7   :  { %v569_v54 = vpop.f32.mrf.mxu1 }
 0x1d8   :  { %v415_v55 = vmax.f32 %v394_v53, 0.0 }
 0x1d9   :  { %v396_v0 = vpop.f32.mrf.mxu1 }
 0x1da   :  { %432 = vst.msk [vmem:[%s857_s5 + $0x80] sm:$0xff] %vm70_vm1, %v415_v55 }
 0x1db   :  { %v570_v56 = vpop.f32.mrf.mxu1 }

</bundles_post_ra>
